<compile_context>
chip_gen: v5e
topology: v5e:2x2
jax: 0.10.0
libtpu: 0.0.40
codegen_flags: <defaults>
</compile_context>

<pallas_src>
import functools

import jax
import jax.numpy as jnp
from jax.experimental import pallas as pl
from jax.experimental.pallas import tpu as pltpu  # noqa: F401  (kept for TPU-specific tuning hooks)

EPS = 1e-5


# ------------------------------ fused kernel ------------------------------- #

def decoder_fused_kernel(tok_ref, neck_ref, wch_ref, bch_ref, gch_ref,
                         bech_ref, ewb_ref, whh_ref, gfin_ref, befin_ref,
                         wfin_ref, bfin_ref, out_ref, *, T, B, LH, V):
    """Whole Decoder forward in one kernel (everything VMEM-resident).

    tok_ref  : (T*B, 1)   int32 tokens, time-major rows (row = t*B + b)
    neck_ref : (B, H)     bottleneck vector
    wch_ref  : (H, 2*LH)  [w_cell | w_hid];  bch/gch/bech: (1, 2*LH)
    ewb_ref  : (V, 4*LH)  embed @ W_ih + (b_ih + b_hh)   (pack-time fusion)
    whh_ref  : (LH, 4*LH) packed W_hh (PyTorch gate order i,f,g,o)
    gfin/befin: (1, LH)   bnorm_final affine; wfin: (LH, V); bfin: (1, V)
    out_ref  : (B*T, V)   b-major rows (row = b*T + t)
    """
    f32 = jnp.float32
    TB = T * B

    # ---- initial (cell, hid) states: fused Linear + ReLU + BatchNorm -------
    # (concatenating cell|hid along features leaves per-column stats intact)
    p = jnp.dot(neck_ref[...], wch_ref[...], preferred_element_type=f32)
    p = jnp.maximum(p + bch_ref[...], 0.0)                      # (B, 2*LH)
    mu = jnp.mean(p, axis=0, keepdims=True)
    var = jnp.mean((p - mu) ** 2, axis=0, keepdims=True)
    pn = (p - mu) * jax.lax.rsqrt(var + EPS) * gch_ref[...] + bech_ref[...]
    c = pn[:, :LH]                      # cell0  (one-time lane slice)
    h = pn[:, LH:]                      # hid0   (one-time lane slice)

    # ---- fused embedding lookup + input projection (hoisted, one matmul) ---
    # one-hot row r selects row tok[r] of ewb exactly -> embed[tok]@W_ih + b
    tok = tok_ref[...]                                          # (TB, 1) int32
    vocab = jax.lax.broadcasted_iota(jnp.int32, (TB, V), 1)
    onehot = jnp.where(vocab == tok, 1.0, 0.0)                  # (TB, V) f32
    gx_all = jnp.dot(onehot, ewb_ref[...], preferred_element_type=f32)  # (TB,4LH)
    # Pre-split per step OUTSIDE the loop: the sublane extraction happens once
    # (off the serial h->h chain); inside the loop each gx_steps[t] is just a
    # ready (B, 4*LH) vreg value.
    gx_steps = [gx_all[t * B:(t + 1) * B, :] for t in range(T)]

    whh = whh_ref[...]                                          # (LH, 4*LH)

    # Hoisted lane mask selecting the g-gate lanes [2*LH, 3*LH).
    lane = jax.lax.broadcasted_iota(jnp.int32, (B, 4 * LH), 1)
    g_mask = (lane >= 2 * LH) & (lane < 3 * LH)

    # ---- recurrence: fully unrolled at trace time (T static & small) -------
    # Per step: 1 lane-dense MXU push/pop + 2 EUP ops on the 128-lane
    # pre-activation (+ tanh(c)); gate extraction is XLU lane-rotate work.
    hs = []
    for t in range(T):
        pre = gx_steps[t] + jnp.dot(h, whh, preferred_element_type=f32)  # (B,4LH)
        sig = jax.nn.sigmoid(pre)
        th = jnp.tanh(pre)
        act = jnp.where(g_mask, th, sig)
        gi = act[:, :LH]
        gf = act[:, LH:2 * LH]
        gg = act[:, 2 * LH:3 * LH]
        go = act[:, 3 * LH:]
        c = gf * c + gi * gg
        h = go * jnp.tanh(c)
        hs.append(h)                     # stays in vregs (2 KB total history)

    # ---- b-major assembly (off the serial chain, XLU shuffles only) --------
    rows = [hs[t][b:b + 1, :] for b in range(B) for t in range(T)]
    hall = jnp.concatenate(rows, axis=0)                        # (B*T, LH)

    # ---- bnorm_final + final Linear + ReLU, single contiguous writeback ----
    mu2 = jnp.mean(hall, axis=0, keepdims=True)
    var2 = jnp.mean((hall - mu2) ** 2, axis=0, keepdims=True)
    hn = (hall - mu2) * jax.lax.rsqrt(var2 + EPS) * gfin_ref[...] + befin_ref[...]
    z = jnp.dot(hn, wfin_ref[...], preferred_element_type=f32) + bfin_ref[...]
    out_ref[...] = jnp.maximum(z, 0.0)                          # (B*T, V)


# -------------------------------- wrapper ----------------------------------- #

def pack_decoder_params(params):
    """One-time (init) parameter packing — hoisted off the per-call path."""
    hi = jax.lax.Precision.HIGHEST
    ewb = (jnp.dot(params["embed"], params["w_ih"], precision=hi)
           + (params["b_ih"] + params["b_hh"])[None, :])        # (V, 4*LH)
    return {
        "w_ch": jnp.concatenate([params["w_cell"], params["w_hid"]], axis=1),
        "b_ch": jnp.concatenate([params["b_cell"], params["b_hid"]]).reshape(1, -1),
        "g_ch": jnp.concatenate([params["g_cell"], params["g_hid"]]).reshape(1, -1),
        "be_ch": jnp.concatenate(
            [params["beta_cell"], params["beta_hid"]]).reshape(1, -1),
        "ewb": ewb,
        "w_hh": params["w_hh"],                                  # (LH, 4*LH)
        "g_fin": params["g_final"].reshape(1, -1),
        "be_fin": params["beta_final"].reshape(1, -1),
        "w_fin": params["w_final"],
        "b_fin": params["b_final"].reshape(1, -1),
    }


@jax.jit
def decoder_forward(tokens, out_neck, packed):
    """tokens: (B, T) int32, out_neck: (B, hidden_size) f32 -> (B, T, vocab)."""
    B, T = tokens.shape
    LH = packed["w_hh"].shape[0]
    V = packed["w_fin"].shape[1]

    # Time-major token column (row = t*B + b) so the kernel's hoisted
    # projection covers the whole sequence in one matmul.
    tok_tm = tokens.T.reshape(T * B, 1).astype(jnp.int32)

    kernel = functools.partial(decoder_fused_kernel, T=T, B=B, LH=LH, V=V)
    out2d = pl.pallas_call(
        kernel,
        out_shape=jax.ShapeDtypeStruct((B * T, V), jnp.float32),
    )(tok_tm, out_neck,
      packed["w_ch"], packed["b_ch"], packed["g_ch"], packed["be_ch"],
      packed["ewb"], packed["w_hh"],
      packed["g_fin"], packed["be_fin"], packed["w_fin"], packed["b_fin"])

    # Kernel rows are b-major -> this reshape is free (metadata only).
    return out2d.reshape(B, T, V)


# ---------------------------- pure-JAX reference ---------------------------- #

def decoder_reference(tokens, out_neck, params):
    emb = jnp.take(params["embed"], tokens, axis=0)

    def proj_bn(x, w, b, g, beta):
        y = jnp.maximum(x @ w + b, 0.0)
        m = y.mean(0, keepdims=True)
        v = ((y - m) ** 2).mean(0, keepdims=True)
        return (y - m) / jnp.sqrt(v + EPS) * g + beta

    cell = proj_bn(out_neck, params["w_cell"], params["b_cell"],
                   params["g_cell"], params["beta_cell"])
    hid = proj_bn(out_neck, params["w_hid"], params["b_hid"],
                  params["g_hid"], params["beta_hid"])
    LH = hid.shape[1]
    b = params["b_ih"] + params["b_hh"]

    def step(carry, x_t):
        h, c = carry
        gates = x_t @ params["w_ih"] + h @ params["w_hh"] + b
        i = jax.nn.sigmoid(gates[:, :LH])
        f = jax.nn.sigmoid(gates[:, LH:2 * LH])
        g_ = jnp.tanh(gates[:, 2 * LH:3 * LH])
        o = jax.nn.sigmoid(gates[:, 3 * LH:])
        c = f * c + i * g_
        h = o * jnp.tanh(c)
        return (h, c), h

    x_tm = jnp.transpose(emb, (1, 0, 2))
    _, hs = jax.lax.scan(step, (hid, cell), x_tm)            # (T, B, LH)

    yf = hs.reshape(-1, LH)
    m = yf.mean(0)
    v = ((yf - m) ** 2).mean(0)
    yn = (hs - m) / jnp.sqrt(v + EPS) * params["g_final"] + params["beta_final"]
    z = jnp.maximum(yn @ params["w_final"] + params["b_final"], 0.0)
    return jnp.transpose(z, (1, 0, 2))


# ----------------------------------- main ----------------------------------- #

if __name__ == "__main__":
    V, H, LH, NL = 40, 128, 32, 1       # input_size, hidden_size, lstm_hidden
    B, T = 2, 8

    key = jax.random.PRNGKey(0)
    ks = jax.random.split(key, 20)

    params = {
        "embed":      0.1 * jax.random.normal(ks[0], (V, 128), jnp.float32),
        "w_cell":     0.1 * jax.random.normal(ks[1], (H, LH * NL), jnp.float32),
        "b_cell":     0.1 * jax.random.normal(ks[2], (LH * NL,), jnp.float32),
        "w_hid":      0.1 * jax.random.normal(ks[3], (H, LH * NL), jnp.float32),
        "b_hid":      0.1 * jax.random.normal(ks[4], (LH * NL,), jnp.float32),
        "w_ih":       0.1 * jax.random.normal(ks[5], (H, 4 * LH), jnp.float32),
        "w_hh":       0.1 * jax.random.normal(ks[6], (LH, 4 * LH), jnp.float32),
        "b_ih":       0.1 * jax.random.normal(ks[7], (4 * LH,), jnp.float32),
        "b_hh":       0.1 * jax.random.normal(ks[8], (4 * LH,), jnp.float32),
        "w_final":    0.1 * jax.random.normal(ks[9], (LH, V), jnp.float32),
        "b_final":    0.1 * jax.random.normal(ks[10], (V,), jnp.float32),
        "g_cell":     1.0 + 0.1 * jax.random.normal(ks[11], (LH,), jnp.float32),
        "beta_cell":  0.1 * jax.random.normal(ks[12], (LH,), jnp.float32),
        "g_hid":      1.0 + 0.1 * jax.random.normal(ks[13], (LH,), jnp.float32),
        "beta_hid":   0.1 * jax.random.normal(ks[14], (LH,), jnp.float32),
        "g_final":    1.0 + 0.1 * jax.random.normal(ks[15], (LH,), jnp.float32),
        "beta_final": 0.1 * jax.random.normal(ks[16], (LH,), jnp.float32),
    }

    tokens = jax.random.randint(ks[17], (B, T), 0, V, dtype=jnp.int32)
    out_neck = jax.random.normal(ks[18], (B, H), jnp.float32)

    # Init-time packing (hoisted off the per-call path).
    packed = pack_decoder_params(params)
    packed = jax.tree_util.tree_map(jax.block_until_ready, packed)

    out = decoder_forward(tokens, out_neck, packed)
    out = jax.block_until_ready(out)
    assert out.shape == (B, T, V), out.shape

    ref = decoder_reference(tokens, out_neck, params)
    max_err = float(jnp.max(jnp.abs(out - ref)))
    assert max_err < 1e-3, f"mismatch vs reference: {max_err}"

    print("KERNEL_OK")
</pallas_src>

<mosaic_0001>
module attributes {stable_mosaic.version = 11 : i64} {
  func.func @decoder_fused_kernel(%arg0: memref<16x1xi32, #tpu.memory_space<vmem>>, %arg1: memref<2x128xf32, #tpu.memory_space<vmem>>, %arg2: memref<128x64xf32, #tpu.memory_space<vmem>>, %arg3: memref<1x64xf32, #tpu.memory_space<vmem>>, %arg4: memref<1x64xf32, #tpu.memory_space<vmem>>, %arg5: memref<1x64xf32, #tpu.memory_space<vmem>>, %arg6: memref<40x128xf32, #tpu.memory_space<vmem>>, %arg7: memref<32x128xf32, #tpu.memory_space<vmem>>, %arg8: memref<1x32xf32, #tpu.memory_space<vmem>>, %arg9: memref<1x32xf32, #tpu.memory_space<vmem>>, %arg10: memref<32x40xf32, #tpu.memory_space<vmem>>, %arg11: memref<1x40xf32, #tpu.memory_space<vmem>>, %arg12: memref<16x40xf32, #tpu.memory_space<vmem>>) attributes {dimension_semantics = [], scalar_prefetch = 0 : i64, scratch_operands = 0 : i64, tpu.core_type = #tpu.core_type<tc>} {
    %c0 = arith.constant 0 : index
    %c0_0 = arith.constant 0 : index
    %0 = vector.load %arg1[%c0, %c0_0] : memref<2x128xf32, #tpu.memory_space<vmem>>, vector<2x128xf32>
    %c0_1 = arith.constant 0 : index
    %c0_2 = arith.constant 0 : index
    %1 = vector.load %arg2[%c0_1, %c0_2] : memref<128x64xf32, #tpu.memory_space<vmem>>, vector<128x64xf32>
    %cst = arith.constant dense<0.000000e+00> : vector<2x64xf32>
    %2 = tpu.matmul %0, %1, %cst {dimension_numbers = #tpu.dot_dimension_numbers<[1], [0], [0], [1], [0, 0, 1, 1], [], []>} : vector<2x128xf32>, vector<128x64xf32>, vector<2x64xf32> -> vector<2x64xf32>
    %c0_3 = arith.constant 0 : index
    %c0_4 = arith.constant 0 : index
    %3 = vector.load %arg3[%c0_3, %c0_4] : memref<1x64xf32, #tpu.memory_space<vmem>>, vector<1x64xf32>
    %4 = vector.broadcast %3 : vector<1x64xf32> to vector<2x64xf32>
    %5 = arith.addf %2, %4 : vector<2x64xf32>
    %cst_5 = arith.constant 0.000000e+00 : f32
    %6 = vector.broadcast %cst_5 : f32 to vector<2x64xf32>
    %7 = arith.maximumf %5, %6 : vector<2x64xf32>
    %cst_6 = arith.constant dense<0.000000e+00> : vector<64xf32>
    %8 = vector.multi_reduction <add>, %7, %cst_6 [0] : vector<2x64xf32> to vector<64xf32>
    %9 = vector.shape_cast %8 : vector<64xf32> to vector<1x64xf32>
    %cst_7 = arith.constant 2.000000e+00 : f32
    %10 = vector.broadcast %cst_7 : f32 to vector<1x64xf32>
    %11 = arith.divf %9, %10 : vector<1x64xf32>
    %12 = vector.broadcast %11 : vector<1x64xf32> to vector<2x64xf32>
    %13 = arith.subf %7, %12 : vector<2x64xf32>
    %14 = arith.mulf %13, %13 : vector<2x64xf32>
    %cst_8 = arith.constant dense<0.000000e+00> : vector<64xf32>
    %15 = vector.multi_reduction <add>, %14, %cst_8 [0] : vector<2x64xf32> to vector<64xf32>
    %16 = vector.shape_cast %15 : vector<64xf32> to vector<1x64xf32>
    %cst_9 = arith.constant 2.000000e+00 : f32
    %17 = vector.broadcast %cst_9 : f32 to vector<1x64xf32>
    %18 = arith.divf %16, %17 : vector<1x64xf32>
    %19 = vector.broadcast %11 : vector<1x64xf32> to vector<2x64xf32>
    %20 = arith.subf %7, %19 : vector<2x64xf32>
    %cst_10 = arith.constant 9.99999974E-6 : f32
    %21 = vector.broadcast %cst_10 : f32 to vector<1x64xf32>
    %22 = arith.addf %18, %21 : vector<1x64xf32>
    %23 = math.rsqrt %22 : vector<1x64xf32>
    %24 = vector.broadcast %23 : vector<1x64xf32> to vector<2x64xf32>
    %25 = arith.mulf %20, %24 : vector<2x64xf32>
    %c0_11 = arith.constant 0 : index
    %c0_12 = arith.constant 0 : index
    %26 = vector.load %arg4[%c0_11, %c0_12] : memref<1x64xf32, #tpu.memory_space<vmem>>, vector<1x64xf32>
    %27 = vector.broadcast %26 : vector<1x64xf32> to vector<2x64xf32>
    %28 = arith.mulf %25, %27 : vector<2x64xf32>
    %c0_13 = arith.constant 0 : index
    %c0_14 = arith.constant 0 : index
    %29 = vector.load %arg5[%c0_13, %c0_14] : memref<1x64xf32, #tpu.memory_space<vmem>>, vector<1x64xf32>
    %30 = vector.broadcast %29 : vector<1x64xf32> to vector<2x64xf32>
    %31 = arith.addf %28, %30 : vector<2x64xf32>
    %32 = vector.extract_strided_slice %31 {offsets = [0, 0], sizes = [2, 32], strides = [1, 1]} : vector<2x64xf32> to vector<2x32xf32>
    %33 = vector.extract_strided_slice %31 {offsets = [0, 32], sizes = [2, 32], strides = [1, 1]} : vector<2x64xf32> to vector<2x32xf32>
    %c0_15 = arith.constant 0 : index
    %c0_16 = arith.constant 0 : index
    %34 = vector.load %arg0[%c0_15, %c0_16] : memref<16x1xi32, #tpu.memory_space<vmem>>, vector<16x1xi32>
    %35 = tpu.iota {dimensions = array<i32: 1>} : vector<16x40xi32>
    %36 = vector.broadcast %34 : vector<16x1xi32> to vector<16x40xi32>
    %37 = arith.cmpi eq, %35, %36 : vector<16x40xi32>
    %cst_17 = arith.constant 1.000000e+00 : f32
    %cst_18 = arith.constant 0.000000e+00 : f32
    %38 = vector.broadcast %cst_17 : f32 to vector<16x40xf32>
    %39 = vector.broadcast %cst_18 : f32 to vector<16x40xf32>
    %40 = arith.select %37, %38, %39 : vector<16x40xi1>, vector<16x40xf32>
    %c0_19 = arith.constant 0 : index
    %c0_20 = arith.constant 0 : index
    %41 = vector.load %arg6[%c0_19, %c0_20] : memref<40x128xf32, #tpu.memory_space<vmem>>, vector<40x128xf32>
    %cst_21 = arith.constant dense<0.000000e+00> : vector<16x128xf32>
    %42 = tpu.matmul %40, %41, %cst_21 {dimension_numbers = #tpu.dot_dimension_numbers<[1], [0], [0], [1], [0, 0, 1, 1], [], []>} : vector<16x40xf32>, vector<40x128xf32>, vector<16x128xf32> -> vector<16x128xf32>
    %43 = vector.extract_strided_slice %42 {offsets = [0, 0], sizes = [2, 128], strides = [1, 1]} : vector<16x128xf32> to vector<2x128xf32>
    %44 = vector.extract_strided_slice %42 {offsets = [2, 0], sizes = [2, 128], strides = [1, 1]} : vector<16x128xf32> to vector<2x128xf32>
    %45 = vector.extract_strided_slice %42 {offsets = [4, 0], sizes = [2, 128], strides = [1, 1]} : vector<16x128xf32> to vector<2x128xf32>
    %46 = vector.extract_strided_slice %42 {offsets = [6, 0], sizes = [2, 128], strides = [1, 1]} : vector<16x128xf32> to vector<2x128xf32>
    %47 = vector.extract_strided_slice %42 {offsets = [8, 0], sizes = [2, 128], strides = [1, 1]} : vector<16x128xf32> to vector<2x128xf32>
    %48 = vector.extract_strided_slice %42 {offsets = [10, 0], sizes = [2, 128], strides = [1, 1]} : vector<16x128xf32> to vector<2x128xf32>
    %49 = vector.extract_strided_slice %42 {offsets = [12, 0], sizes = [2, 128], strides = [1, 1]} : vector<16x128xf32> to vector<2x128xf32>
    %50 = vector.extract_strided_slice %42 {offsets = [14, 0], sizes = [2, 128], strides = [1, 1]} : vector<16x128xf32> to vector<2x128xf32>
    %c0_22 = arith.constant 0 : index
    %c0_23 = arith.constant 0 : index
    %51 = vector.load %arg7[%c0_22, %c0_23] : memref<32x128xf32, #tpu.memory_space<vmem>>, vector<32x128xf32>
    %52 = tpu.iota {dimensions = array<i32: 1>} : vector<2x128xi32>
    %c64_i32 = arith.constant 64 : i32
    %53 = vector.broadcast %c64_i32 : i32 to vector<2x128xi32>
    %54 = arith.cmpi sge, %52, %53 : vector<2x128xi32>
    %c96_i32 = arith.constant 96 : i32
    %55 = vector.broadcast %c96_i32 : i32 to vector<2x128xi32>
    %56 = arith.cmpi slt, %52, %55 : vector<2x128xi32>
    %57 = arith.andi %54, %56 : vector<2x128xi1>
    %cst_24 = arith.constant dense<0.000000e+00> : vector<2x128xf32>
    %58 = tpu.matmul %33, %51, %cst_24 {dimension_numbers = #tpu.dot_dimension_numbers<[1], [0], [0], [1], [0, 0, 1, 1], [], []>} : vector<2x32xf32>, vector<32x128xf32>, vector<2x128xf32> -> vector<2x128xf32>
    %59 = arith.addf %43, %58 : vector<2x128xf32>
    %60 = arith.negf %59 : vector<2x128xf32>
    %61 = math.exp %60 : vector<2x128xf32>
    %cst_25 = arith.constant 1.000000e+00 : f32
    %62 = vector.broadcast %cst_25 : f32 to vector<2x128xf32>
    %63 = arith.addf %62, %61 : vector<2x128xf32>
    %64 = arith.divf %62, %63 : vector<2x128xf32>
    %65 = math.tanh %59 : vector<2x128xf32>
    %66 = arith.select %57, %65, %64 : vector<2x128xi1>, vector<2x128xf32>
    %67 = vector.extract_strided_slice %66 {offsets = [0, 0], sizes = [2, 32], strides = [1, 1]} : vector<2x128xf32> to vector<2x32xf32>
    %68 = vector.extract_strided_slice %66 {offsets = [0, 32], sizes = [2, 32], strides = [1, 1]} : vector<2x128xf32> to vector<2x32xf32>
    %69 = vector.extract_strided_slice %66 {offsets = [0, 64], sizes = [2, 32], strides = [1, 1]} : vector<2x128xf32> to vector<2x32xf32>
    %70 = vector.extract_strided_slice %66 {offsets = [0, 96], sizes = [2, 32], strides = [1, 1]} : vector<2x128xf32> to vector<2x32xf32>
    %71 = arith.mulf %68, %32 : vector<2x32xf32>
    %72 = arith.mulf %67, %69 : vector<2x32xf32>
    %73 = arith.addf %71, %72 : vector<2x32xf32>
    %74 = math.tanh %73 : vector<2x32xf32>
    %75 = arith.mulf %70, %74 : vector<2x32xf32>
    %cst_26 = arith.constant dense<0.000000e+00> : vector<2x128xf32>
    %76 = tpu.matmul %75, %51, %cst_26 {dimension_numbers = #tpu.dot_dimension_numbers<[1], [0], [0], [1], [0, 0, 1, 1], [], []>} : vector<2x32xf32>, vector<32x128xf32>, vector<2x128xf32> -> vector<2x128xf32>
    %77 = arith.addf %44, %76 : vector<2x128xf32>
    %78 = arith.negf %77 : vector<2x128xf32>
    %79 = math.exp %78 : vector<2x128xf32>
    %cst_27 = arith.constant 1.000000e+00 : f32
    %80 = vector.broadcast %cst_27 : f32 to vector<2x128xf32>
    %81 = arith.addf %80, %79 : vector<2x128xf32>
    %82 = arith.divf %80, %81 : vector<2x128xf32>
    %83 = math.tanh %77 : vector<2x128xf32>
    %84 = arith.select %57, %83, %82 : vector<2x128xi1>, vector<2x128xf32>
    %85 = vector.extract_strided_slice %84 {offsets = [0, 0], sizes = [2, 32], strides = [1, 1]} : vector<2x128xf32> to vector<2x32xf32>
    %86 = vector.extract_strided_slice %84 {offsets = [0, 32], sizes = [2, 32], strides = [1, 1]} : vector<2x128xf32> to vector<2x32xf32>
    %87 = vector.extract_strided_slice %84 {offsets = [0, 64], sizes = [2, 32], strides = [1, 1]} : vector<2x128xf32> to vector<2x32xf32>
    %88 = vector.extract_strided_slice %84 {offsets = [0, 96], sizes = [2, 32], strides = [1, 1]} : vector<2x128xf32> to vector<2x32xf32>
    %89 = arith.mulf %86, %73 : vector<2x32xf32>
    %90 = arith.mulf %85, %87 : vector<2x32xf32>
    %91 = arith.addf %89, %90 : vector<2x32xf32>
    %92 = math.tanh %91 : vector<2x32xf32>
    %93 = arith.mulf %88, %92 : vector<2x32xf32>
    %cst_28 = arith.constant dense<0.000000e+00> : vector<2x128xf32>
    %94 = tpu.matmul %93, %51, %cst_28 {dimension_numbers = #tpu.dot_dimension_numbers<[1], [0], [0], [1], [0, 0, 1, 1], [], []>} : vector<2x32xf32>, vector<32x128xf32>, vector<2x128xf32> -> vector<2x128xf32>
    %95 = arith.addf %45, %94 : vector<2x128xf32>
    %96 = arith.negf %95 : vector<2x128xf32>
    %97 = math.exp %96 : vector<2x128xf32>
    %cst_29 = arith.constant 1.000000e+00 : f32
    %98 = vector.broadcast %cst_29 : f32 to vector<2x128xf32>
    %99 = arith.addf %98, %97 : vector<2x128xf32>
    %100 = arith.divf %98, %99 : vector<2x128xf32>
    %101 = math.tanh %95 : vector<2x128xf32>
    %102 = arith.select %57, %101, %100 : vector<2x128xi1>, vector<2x128xf32>
    %103 = vector.extract_strided_slice %102 {offsets = [0, 0], sizes = [2, 32], strides = [1, 1]} : vector<2x128xf32> to vector<2x32xf32>
    %104 = vector.extract_strided_slice %102 {offsets = [0, 32], sizes = [2, 32], strides = [1, 1]} : vector<2x128xf32> to vector<2x32xf32>
    %105 = vector.extract_strided_slice %102 {offsets = [0, 64], sizes = [2, 32], strides = [1, 1]} : vector<2x128xf32> to vector<2x32xf32>
    %106 = vector.extract_strided_slice %102 {offsets = [0, 96], sizes = [2, 32], strides = [1, 1]} : vector<2x128xf32> to vector<2x32xf32>
    %107 = arith.mulf %104, %91 : vector<2x32xf32>
    %108 = arith.mulf %103, %105 : vector<2x32xf32>
    %109 = arith.addf %107, %108 : vector<2x32xf32>
    %110 = math.tanh %109 : vector<2x32xf32>
    %111 = arith.mulf %106, %110 : vector<2x32xf32>
    %cst_30 = arith.constant dense<0.000000e+00> : vector<2x128xf32>
    %112 = tpu.matmul %111, %51, %cst_30 {dimension_numbers = #tpu.dot_dimension_numbers<[1], [0], [0], [1], [0, 0, 1, 1], [], []>} : vector<2x32xf32>, vector<32x128xf32>, vector<2x128xf32> -> vector<2x128xf32>
    %113 = arith.addf %46, %112 : vector<2x128xf32>
    %114 = arith.negf %113 : vector<2x128xf32>
    %115 = math.exp %114 : vector<2x128xf32>
    %cst_31 = arith.constant 1.000000e+00 : f32
    %116 = vector.broadcast %cst_31 : f32 to vector<2x128xf32>
    %117 = arith.addf %116, %115 : vector<2x128xf32>
    %118 = arith.divf %116, %117 : vector<2x128xf32>
    %119 = math.tanh %113 : vector<2x128xf32>
    %120 = arith.select %57, %119, %118 : vector<2x128xi1>, vector<2x128xf32>
    %121 = vector.extract_strided_slice %120 {offsets = [0, 0], sizes = [2, 32], strides = [1, 1]} : vector<2x128xf32> to vector<2x32xf32>
    %122 = vector.extract_strided_slice %120 {offsets = [0, 32], sizes = [2, 32], strides = [1, 1]} : vector<2x128xf32> to vector<2x32xf32>
    %123 = vector.extract_strided_slice %120 {offsets = [0, 64], sizes = [2, 32], strides = [1, 1]} : vector<2x128xf32> to vector<2x32xf32>
    %124 = vector.extract_strided_slice %120 {offsets = [0, 96], sizes = [2, 32], strides = [1, 1]} : vector<2x128xf32> to vector<2x32xf32>
    %125 = arith.mulf %122, %109 : vector<2x32xf32>
    %126 = arith.mulf %121, %123 : vector<2x32xf32>
    %127 = arith.addf %125, %126 : vector<2x32xf32>
    %128 = math.tanh %127 : vector<2x32xf32>
    %129 = arith.mulf %124, %128 : vector<2x32xf32>
    %cst_32 = arith.constant dense<0.000000e+00> : vector<2x128xf32>
    %130 = tpu.matmul %129, %51, %cst_32 {dimension_numbers = #tpu.dot_dimension_numbers<[1], [0], [0], [1], [0, 0, 1, 1], [], []>} : vector<2x32xf32>, vector<32x128xf32>, vector<2x128xf32> -> vector<2x128xf32>
    %131 = arith.addf %47, %130 : vector<2x128xf32>
    %132 = arith.negf %131 : vector<2x128xf32>
    %133 = math.exp %132 : vector<2x128xf32>
    %cst_33 = arith.constant 1.000000e+00 : f32
    %134 = vector.broadcast %cst_33 : f32 to vector<2x128xf32>
    %135 = arith.addf %134, %133 : vector<2x128xf32>
    %136 = arith.divf %134, %135 : vector<2x128xf32>
    %137 = math.tanh %131 : vector<2x128xf32>
    %138 = arith.select %57, %137, %136 : vector<2x128xi1>, vector<2x128xf32>
    %139 = vector.extract_strided_slice %138 {offsets = [0, 0], sizes = [2, 32], strides = [1, 1]} : vector<2x128xf32> to vector<2x32xf32>
    %140 = vector.extract_strided_slice %138 {offsets = [0, 32], sizes = [2, 32], strides = [1, 1]} : vector<2x128xf32> to vector<2x32xf32>
    %141 = vector.extract_strided_slice %138 {offsets = [0, 64], sizes = [2, 32], strides = [1, 1]} : vector<2x128xf32> to vector<2x32xf32>
    %142 = vector.extract_strided_slice %138 {offsets = [0, 96], sizes = [2, 32], strides = [1, 1]} : vector<2x128xf32> to vector<2x32xf32>
    %143 = arith.mulf %140, %127 : vector<2x32xf32>
    %144 = arith.mulf %139, %141 : vector<2x32xf32>
    %145 = arith.addf %143, %144 : vector<2x32xf32>
    %146 = math.tanh %145 : vector<2x32xf32>
    %147 = arith.mulf %142, %146 : vector<2x32xf32>
    %cst_34 = arith.constant dense<0.000000e+00> : vector<2x128xf32>
    %148 = tpu.matmul %147, %51, %cst_34 {dimension_numbers = #tpu.dot_dimension_numbers<[1], [0], [0], [1], [0, 0, 1, 1], [], []>} : vector<2x32xf32>, vector<32x128xf32>, vector<2x128xf32> -> vector<2x128xf32>
    %149 = arith.addf %48, %148 : vector<2x128xf32>
    %150 = arith.negf %149 : vector<2x128xf32>
    %151 = math.exp %150 : vector<2x128xf32>
    %cst_35 = arith.constant 1.000000e+00 : f32
    %152 = vector.broadcast %cst_35 : f32 to vector<2x128xf32>
    %153 = arith.addf %152, %151 : vector<2x128xf32>
    %154 = arith.divf %152, %153 : vector<2x128xf32>
    %155 = math.tanh %149 : vector<2x128xf32>
    %156 = arith.select %57, %155, %154 : vector<2x128xi1>, vector<2x128xf32>
    %157 = vector.extract_strided_slice %156 {offsets = [0, 0], sizes = [2, 32], strides = [1, 1]} : vector<2x128xf32> to vector<2x32xf32>
    %158 = vector.extract_strided_slice %156 {offsets = [0, 32], sizes = [2, 32], strides = [1, 1]} : vector<2x128xf32> to vector<2x32xf32>
    %159 = vector.extract_strided_slice %156 {offsets = [0, 64], sizes = [2, 32], strides = [1, 1]} : vector<2x128xf32> to vector<2x32xf32>
    %160 = vector.extract_strided_slice %156 {offsets = [0, 96], sizes = [2, 32], strides = [1, 1]} : vector<2x128xf32> to vector<2x32xf32>
    %161 = arith.mulf %158, %145 : vector<2x32xf32>
    %162 = arith.mulf %157, %159 : vector<2x32xf32>
    %163 = arith.addf %161, %162 : vector<2x32xf32>
    %164 = math.tanh %163 : vector<2x32xf32>
    %165 = arith.mulf %160, %164 : vector<2x32xf32>
    %cst_36 = arith.constant dense<0.000000e+00> : vector<2x128xf32>
    %166 = tpu.matmul %165, %51, %cst_36 {dimension_numbers = #tpu.dot_dimension_numbers<[1], [0], [0], [1], [0, 0, 1, 1], [], []>} : vector<2x32xf32>, vector<32x128xf32>, vector<2x128xf32> -> vector<2x128xf32>
    %167 = arith.addf %49, %166 : vector<2x128xf32>
    %168 = arith.negf %167 : vector<2x128xf32>
    %169 = math.exp %168 : vector<2x128xf32>
    %cst_37 = arith.constant 1.000000e+00 : f32
    %170 = vector.broadcast %cst_37 : f32 to vector<2x128xf32>
    %171 = arith.addf %170, %169 : vector<2x128xf32>
    %172 = arith.divf %170, %171 : vector<2x128xf32>
    %173 = math.tanh %167 : vector<2x128xf32>
    %174 = arith.select %57, %173, %172 : vector<2x128xi1>, vector<2x128xf32>
    %175 = vector.extract_strided_slice %174 {offsets = [0, 0], sizes = [2, 32], strides = [1, 1]} : vector<2x128xf32> to vector<2x32xf32>
    %176 = vector.extract_strided_slice %174 {offsets = [0, 32], sizes = [2, 32], strides = [1, 1]} : vector<2x128xf32> to vector<2x32xf32>
    %177 = vector.extract_strided_slice %174 {offsets = [0, 64], sizes = [2, 32], strides = [1, 1]} : vector<2x128xf32> to vector<2x32xf32>
    %178 = vector.extract_strided_slice %174 {offsets = [0, 96], sizes = [2, 32], strides = [1, 1]} : vector<2x128xf32> to vector<2x32xf32>
    %179 = arith.mulf %176, %163 : vector<2x32xf32>
    %180 = arith.mulf %175, %177 : vector<2x32xf32>
    %181 = arith.addf %179, %180 : vector<2x32xf32>
    %182 = math.tanh %181 : vector<2x32xf32>
    %183 = arith.mulf %178, %182 : vector<2x32xf32>
    %cst_38 = arith.constant dense<0.000000e+00> : vector<2x128xf32>
    %184 = tpu.matmul %183, %51, %cst_38 {dimension_numbers = #tpu.dot_dimension_numbers<[1], [0], [0], [1], [0, 0, 1, 1], [], []>} : vector<2x32xf32>, vector<32x128xf32>, vector<2x128xf32> -> vector<2x128xf32>
    %185 = arith.addf %50, %184 : vector<2x128xf32>
    %186 = arith.negf %185 : vector<2x128xf32>
    %187 = math.exp %186 : vector<2x128xf32>
    %cst_39 = arith.constant 1.000000e+00 : f32
    %188 = vector.broadcast %cst_39 : f32 to vector<2x128xf32>
    %189 = arith.addf %188, %187 : vector<2x128xf32>
    %190 = arith.divf %188, %189 : vector<2x128xf32>
    %191 = math.tanh %185 : vector<2x128xf32>
    %192 = arith.select %57, %191, %190 : vector<2x128xi1>, vector<2x128xf32>
    %193 = vector.extract_strided_slice %192 {offsets = [0, 0], sizes = [2, 32], strides = [1, 1]} : vector<2x128xf32> to vector<2x32xf32>
    %194 = vector.extract_strided_slice %192 {offsets = [0, 32], sizes = [2, 32], strides = [1, 1]} : vector<2x128xf32> to vector<2x32xf32>
    %195 = vector.extract_strided_slice %192 {offsets = [0, 64], sizes = [2, 32], strides = [1, 1]} : vector<2x128xf32> to vector<2x32xf32>
    %196 = vector.extract_strided_slice %192 {offsets = [0, 96], sizes = [2, 32], strides = [1, 1]} : vector<2x128xf32> to vector<2x32xf32>
    %197 = arith.mulf %194, %181 : vector<2x32xf32>
    %198 = arith.mulf %193, %195 : vector<2x32xf32>
    %199 = arith.addf %197, %198 : vector<2x32xf32>
    %200 = math.tanh %199 : vector<2x32xf32>
    %201 = arith.mulf %196, %200 : vector<2x32xf32>
    %202 = vector.extract_strided_slice %75 {offsets = [0, 0], sizes = [1, 32], strides = [1, 1]} : vector<2x32xf32> to vector<1x32xf32>
    %203 = vector.extract_strided_slice %93 {offsets = [0, 0], sizes = [1, 32], strides = [1, 1]} : vector<2x32xf32> to vector<1x32xf32>
    %204 = vector.extract_strided_slice %111 {offsets = [0, 0], sizes = [1, 32], strides = [1, 1]} : vector<2x32xf32> to vector<1x32xf32>
    %205 = vector.extract_strided_slice %129 {offsets = [0, 0], sizes = [1, 32], strides = [1, 1]} : vector<2x32xf32> to vector<1x32xf32>
    %206 = vector.extract_strided_slice %147 {offsets = [0, 0], sizes = [1, 32], strides = [1, 1]} : vector<2x32xf32> to vector<1x32xf32>
    %207 = vector.extract_strided_slice %165 {offsets = [0, 0], sizes = [1, 32], strides = [1, 1]} : vector<2x32xf32> to vector<1x32xf32>
    %208 = vector.extract_strided_slice %183 {offsets = [0, 0], sizes = [1, 32], strides = [1, 1]} : vector<2x32xf32> to vector<1x32xf32>
    %209 = vector.extract_strided_slice %201 {offsets = [0, 0], sizes = [1, 32], strides = [1, 1]} : vector<2x32xf32> to vector<1x32xf32>
    %210 = vector.extract_strided_slice %75 {offsets = [1, 0], sizes = [1, 32], strides = [1, 1]} : vector<2x32xf32> to vector<1x32xf32>
    %211 = vector.extract_strided_slice %93 {offsets = [1, 0], sizes = [1, 32], strides = [1, 1]} : vector<2x32xf32> to vector<1x32xf32>
    %212 = vector.extract_strided_slice %111 {offsets = [1, 0], sizes = [1, 32], strides = [1, 1]} : vector<2x32xf32> to vector<1x32xf32>
    %213 = vector.extract_strided_slice %129 {offsets = [1, 0], sizes = [1, 32], strides = [1, 1]} : vector<2x32xf32> to vector<1x32xf32>
    %214 = vector.extract_strided_slice %147 {offsets = [1, 0], sizes = [1, 32], strides = [1, 1]} : vector<2x32xf32> to vector<1x32xf32>
    %215 = vector.extract_strided_slice %165 {offsets = [1, 0], sizes = [1, 32], strides = [1, 1]} : vector<2x32xf32> to vector<1x32xf32>
    %216 = vector.extract_strided_slice %183 {offsets = [1, 0], sizes = [1, 32], strides = [1, 1]} : vector<2x32xf32> to vector<1x32xf32>
    %217 = vector.extract_strided_slice %201 {offsets = [1, 0], sizes = [1, 32], strides = [1, 1]} : vector<2x32xf32> to vector<1x32xf32>
    %218 = tpu.concatenate %202, %203, %204, %205, %206, %207, %208, %209, %210, %211, %212, %213, %214, %215, %216, %217 in 0 : vector<1x32xf32>, vector<1x32xf32>, vector<1x32xf32>, vector<1x32xf32>, vector<1x32xf32>, vector<1x32xf32>, vector<1x32xf32>, vector<1x32xf32>, vector<1x32xf32>, vector<1x32xf32>, vector<1x32xf32>, vector<1x32xf32>, vector<1x32xf32>, vector<1x32xf32>, vector<1x32xf32>, vector<1x32xf32> -> vector<16x32xf32>
    %cst_40 = arith.constant dense<0.000000e+00> : vector<32xf32>
    %219 = vector.multi_reduction <add>, %218, %cst_40 [0] : vector<16x32xf32> to vector<32xf32>
    %220 = vector.shape_cast %219 : vector<32xf32> to vector<1x32xf32>
    %cst_41 = arith.constant 1.600000e+01 : f32
    %221 = vector.broadcast %cst_41 : f32 to vector<1x32xf32>
    %222 = arith.divf %220, %221 : vector<1x32xf32>
    %223 = vector.broadcast %222 : vector<1x32xf32> to vector<16x32xf32>
    %224 = arith.subf %218, %223 : vector<16x32xf32>
    %225 = arith.mulf %224, %224 : vector<16x32xf32>
    %cst_42 = arith.constant dense<0.000000e+00> : vector<32xf32>
    %226 = vector.multi_reduction <add>, %225, %cst_42 [0] : vector<16x32xf32> to vector<32xf32>
    %227 = vector.shape_cast %226 : vector<32xf32> to vector<1x32xf32>
    %cst_43 = arith.constant 1.600000e+01 : f32
    %228 = vector.broadcast %cst_43 : f32 to vector<1x32xf32>
    %229 = arith.divf %227, %228 : vector<1x32xf32>
    %230 = vector.broadcast %222 : vector<1x32xf32> to vector<16x32xf32>
    %231 = arith.subf %218, %230 : vector<16x32xf32>
    %cst_44 = arith.constant 9.99999974E-6 : f32
    %232 = vector.broadcast %cst_44 : f32 to vector<1x32xf32>
    %233 = arith.addf %229, %232 : vector<1x32xf32>
    %234 = math.rsqrt %233 : vector<1x32xf32>
    %235 = vector.broadcast %234 : vector<1x32xf32> to vector<16x32xf32>
    %236 = arith.mulf %231, %235 : vector<16x32xf32>
    %c0_45 = arith.constant 0 : index
    %c0_46 = arith.constant 0 : index
    %237 = vector.load %arg8[%c0_45, %c0_46] : memref<1x32xf32, #tpu.memory_space<vmem>>, vector<1x32xf32>
    %238 = vector.broadcast %237 : vector<1x32xf32> to vector<16x32xf32>
    %239 = arith.mulf %236, %238 : vector<16x32xf32>
    %c0_47 = arith.constant 0 : index
    %c0_48 = arith.constant 0 : index
    %240 = vector.load %arg9[%c0_47, %c0_48] : memref<1x32xf32, #tpu.memory_space<vmem>>, vector<1x32xf32>
    %241 = vector.broadcast %240 : vector<1x32xf32> to vector<16x32xf32>
    %242 = arith.addf %239, %241 : vector<16x32xf32>
    %c0_49 = arith.constant 0 : index
    %c0_50 = arith.constant 0 : index
    %243 = vector.load %arg10[%c0_49, %c0_50] : memref<32x40xf32, #tpu.memory_space<vmem>>, vector<32x40xf32>
    %cst_51 = arith.constant dense<0.000000e+00> : vector<16x40xf32>
    %244 = tpu.matmul %242, %243, %cst_51 {dimension_numbers = #tpu.dot_dimension_numbers<[1], [0], [0], [1], [0, 0, 1, 1], [], []>} : vector<16x32xf32>, vector<32x40xf32>, vector<16x40xf32> -> vector<16x40xf32>
    %c0_52 = arith.constant 0 : index
    %c0_53 = arith.constant 0 : index
    %245 = vector.load %arg11[%c0_52, %c0_53] : memref<1x40xf32, #tpu.memory_space<vmem>>, vector<1x40xf32>
    %246 = vector.broadcast %245 : vector<1x40xf32> to vector<16x40xf32>
    %247 = arith.addf %244, %246 : vector<16x40xf32>
    %cst_54 = arith.constant 0.000000e+00 : f32
    %248 = vector.broadcast %cst_54 : f32 to vector<16x40xf32>
    %249 = arith.maximumf %247, %248 : vector<16x40xf32>
    %c0_55 = arith.constant 0 : index
    %c0_56 = arith.constant 0 : index
    %250 = vector.load %arg12[%c0_55, %c0_56] : memref<16x40xf32, #tpu.memory_space<vmem>>, vector<16x40xf32>
    tpu.vector_store %arg12[%c0_55, %c0_56], %249 {strides = array<i32>} : memref<16x40xf32, #tpu.memory_space<vmem>>, vector<16x40xf32>,
    return
  }
}

</mosaic_0001>

<bundles_post_ra>
// kernel: decoder_forward.1
= control target key start
LH: loop header
LB: loop body
LE: loop exit
PB: predicated region body
PF: predicated region fallthrough
CT: control target
= control target key end

     0   :  { %s1387_s0 = inlined_call_operand.vmem [shape: s32[16,1], index: 0, kind: input, shape index: {}]   ;;  %s1388_s1 = inlined_call_operand.vmem [shape: f32[2,128], index: 1, kind: input, shape index: {}]   ;;  %s1389_s2 = inlined_call_operand.vmem [shape: f32[128,64], index: 2, kind: input, shape index: {}]   ;;  %s1390_s3 = inlined_call_operand.vmem [shape: f32[1,64], index: 3, kind: input, shape index: {}]   ;;  %s1391_s4 = inlined_call_operand.vmem [shape: f32[1,64], index: 4, kind: input, shape index: {}]   ;;  %s1392_s5 = inlined_call_operand.vmem [shape: f32[1,64], index: 5, kind: input, shape index: {}]   ;;  %s1393_s6 = inlined_call_operand.vmem [shape: f32[40,128], index: 6, kind: input, shape index: {}]   ;;  %s1394_s7 = inlined_call_operand.vmem [shape: f32[32,128], index: 7, kind: input, shape index: {}]   ;;  %s1395_s8 = inlined_call_operand.vmem [shape: f32[1,32], index: 8, kind: input, shape index: {}]   ;;  %s1396_s9 = inlined_call_operand.vmem [shape: f32[1,32], index: 9, kind: input, shape index: {}]   ;;  %s1397_s10 = inlined_call_operand.vmem [shape: f32[32,40], index: 10, kind: input, shape index: {}]   ;;  %s1398_s11 = inlined_call_operand.vmem [shape: f32[1,40], index: 11, kind: input, shape index: {}]   ;;  %s1399_s12 = inlined_call_operand.hbm [shape: f32[16,40], index: 12, kind: output, shape index: {}]  }
   0x1   :  { %v58_v0 = vld [vmem:[%s1389_s2 + $0x78] sm:$0xff]  ;;  %v57_v1 = vld [vmem:[%s1389_s2 + $0x70] sm:$0xff]  ;;  %v56_v2 = vld [vmem:[%s1389_s2 + $0x68] sm:$0xff] }
   0x2   :  { %63 = vmatpush.msra.mxu0 %v58_v0  ;;  %v55_v3 = vld [vmem:[%s1389_s2 + $0x60] sm:$0xff]  ;;  %v54_v4 = vld [vmem:[%s1389_s2 + $0x58] sm:$0xff]  ;;  %v53_v5 = vld [vmem:[%s1389_s2 + $0x50] sm:$0xff] }
   0x4   :  { %64 = vmatpush.msra.mxu0 %v57_v1 }
   0x6   :  { %65 = vmatpush.msra.mxu0 %v56_v2 }
   0x8   :  { %66 = vmatpush.msra.mxu0 %v55_v3 }
   0x9   :  { %17 = vsyncpa [#allocation3], 0  ;;  %v52_v6 = vld [vmem:[%s1389_s2 + $0x48] sm:$0xff]  ;;  %v51_v7 = vld [vmem:[%s1389_s2 + $0x40] sm:$0xff]  ;;  %v1057_v17 = vmov 2.0   ;;  %vm84_vm0 = vcmask 517120  }
   0xa   :  { %67 = vmatpush.msra.mxu0 %v54_v4  ;;  %v50_v8 = vld [vmem:[%s1389_s2 + $0x38] sm:$0xff]  ;;  %v49_v9 = vld [vmem:[%s1389_s2 + $0x30] sm:$0xff]  ;;  %v48_v10 = vld [vmem:[%s1389_s2 + $0x28] sm:$0xff]  ;;  %959 = vrcp.f32 %v1057_v17  ;;  %v1058_v44 = vmov 0   ;;  %s1059_s29 = smov 96   ;;  %vm191_vm5 = vcmask 261120  }
   0xb   :  { %v47_v11 = vld [vmem:[%s1389_s2 + $0x20] sm:$0xff]  ;;  %v46_v12 = vld [vmem:[%s1389_s2 + $0x18] sm:$0xff]  ;;  %v45_v13 = vld [vmem:[%s1389_s2 + $0x10] sm:$0xff]  ;;  %951 = vset.pattern.permute.xlu0 %v1058_v44  ;;  %952 = vset.pattern.permute.xlu1 %v1058_v44  ;;  %vm151_vm6 = vcmask 326656   ;;  %s1064_s13 = smov [#allocation2]   ;;  %s909_s16 = sshll.u32 %s1399_s12, 4  ;;  %s910_s16 = int_to_ptr.hbm [resolvable:$true] %s909_s16 }
   0xc   :  { %68 = vmatpush.msra.mxu0 %v53_v5  ;;  %v44_v14 = vld [vmem:[%s1389_s2 + $0x8] sm:$0xff]  ;;  %v43_v15 = vld [vmem:[%s1389_s2] sm:$0xff]  ;;  %v1191_v48 = vld [vmem:[%s1394_s7 + $0x18] sm:$0xff]  ;;  %s1062_s2 = smov 32   ;;  %s907_s14 = sshll.u32 %s1064_s13, 4  ;;  %s908_s14 = int_to_ptr.vmem [resolvable:$true] %s907_s14 }
   0xd   :  { %v42_v16 = vld [vmem:[%s1388_s1] sm:$0x3]  ;;  %v1196_v49 = vld [vmem:[%s1394_s7 + $0x10] sm:$0xff]  ;;  %206 = vmatpush.msra.mxu2 %v1191_v48  ;;  %415 = vmatpush.msra.mxu3 %v1191_v48  ;;  %v1203_v50 = vld [vmem:[%s1394_s7 + $0x8] sm:$0xff] }
   0xe   :  { %69 = vmatpush.msra.mxu0 %v52_v6  ;;  %v953_v19 = vld [vmem:[%s1390_s3] ss:$0 sm:$0xff]  ;;  %v149_v2 = vld [vmem:[%s1393_s6 + $0x18] sm:$0xff]  ;;  %v148_v3 = vld [vmem:[%s1393_s6 + $0x10] sm:$0xff] }
   0xf   :  { %207 = vmatpush.msra.mxu2 %v1196_v49  ;;  %416 = vmatpush.msra.mxu3 %v1196_v49  ;;  %v1210_v51 = vld [vmem:[%s1394_s7] sm:$0xff]  ;;  %v147_v4 = vld [vmem:[%s1393_s6 + $0x8] sm:$0xff] }
  0x10   :  { %70 = vmatpush.msra.mxu0 %v51_v7  ;;  %v960_v18 = vpop.eup %959  ;;  %v954_v58 = vld [vmem:[%s1391_s4] ss:$0 sm:$0xff]  ;;  %v134_v7 = vlaneseq }
  0x11   :  { %v93_v20 = vmul.f32 2.0, %v960_v18  ;;  %vm97_vm1 = vweird.f32 %v960_v18  ;;  %208 = vmatpush.msra.mxu2 %v1203_v50  ;;  %417 = vmatpush.msra.mxu3 %v1203_v50  ;;  %v955_v61 = vld [vmem:[%s1392_s5] ss:$0 sm:$0xff]  ;;  %s1065_s5 = smov 128  }
  0x12   :  { %71 = vmatpush.msra.mxu0 %v50_v8  ;;  %v132_v0 = vld [vmem:[%s1387_s0] sm:$0xff]  ;;  %v135_v8 = vand.u32 127, %v134_v7 }
  0x13   :  { %v94_v24 = vsub.f32 1.0, %v93_v20  ;;  %209 = vmatpush.msra.mxu2 %v1210_v51  ;;  %418 = vmatpush.msra.mxu3 %v1210_v51  ;;  %v150_v1 = vld [vmem:[%s1393_s6 + $0x20] sm:$0xff] }
  0x14   :  { %72 = vmatpush.msra.mxu0 %v49_v9  ;;  %169 = vmatpush.msra.mxu1 %v150_v1  ;;  %v146_v5 = vld [vmem:[%s1393_s6] sm:$0xff]  ;;  %vm185_vm8 = vcmp.ge.s32.totalorder %v135_v8, 64  ;;  %vm186_vm9 = vcmp.lt.s32.totalorder %v135_v8, 96  ;;  %s1061_s6 = smov 64  }
  0x15   :  { %v95_v27 = vmul.f32 %v960_v18, %v94_v24  ;;  %344 = vmatpush.msrb.mxu2 %v1191_v48  ;;  %553 = vmatpush.msrb.mxu3 %v1191_v48  ;;  %vm1269_vm11 = vmand %vm185_vm8, %vm186_vm9 }
  0x16   :  { %73 = vmatpush.msra.mxu0 %v48_v10  ;;  %170 = vmatpush.msra.mxu1 %v149_v2  ;;  %v1060_v10 = vmov 0.0  }
  0x17   :  { %v96_v30 = vadd.f32 %v960_v18, %v95_v27  ;;  %345 = vmatpush.msrb.mxu2 %v1196_v49  ;;  %554 = vmatpush.msrb.mxu3 %v1196_v49 }
  0x18   :  { %74 = vmatpush.msra.mxu0 %v47_v11  ;;  %171 = vmatpush.msra.mxu1 %v148_v3 }
  0x19   :  { %v98_v33 = vsel %vm97_vm1, %v960_v18, %v96_v30  ;;  %346 = vmatpush.msrb.mxu2 %v1203_v50  ;;  %555 = vmatpush.msrb.mxu3 %v1203_v50 }
  0x1a   :  { %75 = vmatpush.msra.mxu0 %v46_v12  ;;  %172 = vmatpush.msra.mxu1 %v147_v4 }
  0x1b   :  { %347 = vmatpush.msrb.mxu2 %v1210_v51  ;;  %556 = vmatpush.msrb.mxu3 %v1210_v51 }
  0x1c   :  { %76 = vmatpush.msra.mxu0 %v45_v13  ;;  %173 = vmatpush.msra.mxu1 %v146_v5 }
  0x1e   :  { %77 = vmatpush.msra.mxu0 %v44_v14  ;;  %273 = vmatpush.msrb.mxu1 %v1191_v48 }
  0x20   :  { %78 = vmatpush.msra.mxu0 %v43_v15  ;;  %274 = vmatpush.msrb.mxu1 %v1196_v49 }
  0x21   :  { %79 = vmatmul.f32.vlgmr.msra.gmra.mxu0 %v42_v16 }
  0x22   :  { %275 = vmatpush.msrb.mxu1 %v1203_v50 }
  0x24   :  { %276 = vmatpush.msrb.mxu1 %v1210_v51 }
  0x9e   :  { %v80_v21 = vpop.f32.mrf.mxu0 }
  0x9f   :  { %v81_v22 = vadd.f32 %v953_v19, %v80_v21 }
  0xa1   :  { %v83_v23 = vmax.f32 %v81_v22, 0.0 }
  0xa3   :  { %v85_v25 = vsel %vm84_vm0, %v83_v23, 0.0 }
  0xa4   :  { %v86_v26 = vrot.slane %v85_v25, 4 }
  0xa6   :  { %v87_v28 = vadd.f32 %v86_v26, %v85_v25 }
  0xa8   :  { %v88_v29 = vrot.slane %v87_v28, 2 }
  0xaa   :  { %v89_v31 = vadd.f32 %v88_v29, %v87_v28 }
  0xac   :  { %v90_v32 = vrot.slane %v89_v31, 1 }
  0xae   :  { %v91_v34 = vadd.f32 %v90_v32, %v89_v31 }
  0xb0   :  { %v99_v35 = vmul.f32 %v98_v33, %v91_v34 }
  0xb2   :  { %v100_v36 = vsub.f32 %v83_v23, %v99_v35 }
  0xb4   :  { %v101_v37 = vmul.f32 %v100_v36, %v100_v36 }
  0xb6   :  { %v102_v38 = vsel %vm84_vm0, %v101_v37, 0.0 }
  0xb7   :  { %v103_v39 = vrot.slane %v102_v38, 4 }
  0xb9   :  { %v104_v40 = vadd.f32 %v103_v39, %v102_v38 }
  0xbb   :  { %v105_v41 = vrot.slane %v104_v40, 2 }
  0xbd   :  { %v106_v42 = vadd.f32 %v105_v41, %v104_v40 }
  0xbf   :  { %v107_v43 = vrot.slane %v106_v42, 1 }
  0xc1   :  { %v108_v45 = vadd.f32 %v107_v43, %v106_v42 }
  0xc3   :  { %v109_v46 = vmul.f32 %v108_v45, %v98_v33  ;;  %v133_v33 = vld [vmem:[%s1387_s0 + $0x8] sm:$0xff] }
  0xc5   :  { %v110_v47 = vadd.f32 1e-05, %v109_v46 }
  0xc7   :  { %961 = vrsqrt.f32 %v110_v47  ;;  %vm117_vm3 = vweird.f32 %v110_v47 }
  0xcd   :  { %v962_v52 = vpop.eup %961 }
  0xce   :  { %v112_v53 = vmul.f32 %v962_v52, %v110_v47  ;;  %vm118_vm2 = vweird.f32 %v962_v52 }
  0xcf   :  { %vm119_vm4 = vmor %vm117_vm3, %vm118_vm2 }
  0xd0   :  { %v113_v54 = vmul.f32 %v962_v52, %v112_v53 }
  0xd2   :  { %v114_v55 = vmul.f32 0.5, %v113_v54 }
  0xd4   :  { %v115_v56 = vsub.f32 1.5, %v114_v55 }
  0xd6   :  { %v116_v57 = vmul.f32 %v962_v52, %v115_v56 }
  0xd8   :  { %v120_v59 = vsel %vm119_vm4, %v962_v52, %v116_v57 }
  0xd9   :  { %v121_v60 = vmul.f32 %v120_v59, %v100_v36 }
  0xdb   :  { %v126_v62 = vmul.f32 %v954_v58, %v121_v60 }
  0xdd   :  { %v1230_v63 = vadd.f32 %v955_v61, %v126_v62 }
  0xdf   :  { %189 = vrot.lane.b32.xlu0 %v1230_v63, %s1059_s29 }
  0xe7   :  { %137 = vperm.xlu0 %951, %v132_v0  }
 0x151   :  { %v190_v6 = vpop.permute.xlu0 %189 }
 0x152   :  { %923 = vmatmul.msk.f32.vlgmr.msra.gmra.mxu2 %vm191_vm5, %v190_v6 }
 0x153   :  { %486 = vmatpush.msra.mxu2 %v1191_v48 }
 0x155   :  { %487 = vmatpush.msra.mxu2 %v1196_v49 }
 0x157   :  { %488 = vmatpush.msra.mxu2 %v1203_v50 }
 0x159   :  { %v138_v9 = vpop.permute.xlu0 %137  ;;  %489 = vmatpush.msra.mxu2 %v1210_v51 }
 0x15a   :  { %vm142_vm7 = vcmp.eq.s32.totalorder %v135_v8, %v138_v9 }
 0x15b   :  { %v144_v11 = vsel %vm142_vm7, 1.0, %v1060_v10 }
 0x15c   :  { %921 = vmatmul.msk.f32.vlgmr.msra.gmra.mxu1 %vm151_vm6, %v144_v11 }
 0x15d   :  { %624 = vmatpush.msra.mxu1 %v1191_v48 }
 0x15f   :  { %625 = vmatpush.msra.mxu1 %v1196_v49 }
 0x161   :  { %626 = vmatpush.msra.mxu1 %v1203_v50 }
 0x163   :  { %627 = vmatpush.msra.mxu1 %v1210_v51 }
 0x1d5   :  { %v211_v12 = vpop.f32.mrf.mxu2 }
 0x1d9   :  { %v1266_v13 = vpop.f32.mrf.mxu1 }
 0x1da   :  { %v214_v14 = vadd.f32 %v211_v12, %v1266_v13 }
 0x1dc   :  { %v924_v15 = vmul.f32 -1.442695, %v214_v14 }
 0x1de   :  { %963 = vpow2.f32 %v924_v15 }
 0x1e4   :  { %v964_v16 = vpop.eup %963 }
 0x1e5   :  { %v218_v17 = vadd.f32 1.0, %v964_v16 }
 0x1e7   :  { %965 = vrcp.f32 %v218_v17  ;;  %v230_v21 = vand.u32 2147483648, %v218_v17  ;;  %v228_v23 = vand.u32 2147483647, %v218_v17  ;;  %vm224_vm12 = vweird.f32 %v218_v17 }
 0x1e8   :  { %967 = vtanh.f32 %v214_v14 }
 0x1e9   :  { %v231_v26 = vor.u32 1.1754944e-38, %v230_v21  ;;  %vm229_vm14 = vcmp.eq.f32.partialorder %v228_v23, 8.507059e+37 }
 0x1ed   :  { %v966_v18 = vpop.eup %965 }
 0x1ee   :  { %v220_v19 = vmul.f32 %v966_v18, %v218_v17  ;;  %vm225_vm10 = vweird.f32 %v966_v18  ;;  %v968_v28 = vpop.eup %967 }
 0x1ef   :  { %vm226_vm13 = vmor %vm224_vm12, %vm225_vm10  ;;  %vm776_vm10 = vcmask 1040384   ;;  %vm778_vm12 = vcmask 1041408  }
 0x1f0   :  { %v221_v20 = vsub.f32 1.0, %v220_v19 }
 0x1f2   :  { %v222_v22 = vmul.f32 %v966_v18, %v221_v20 }
 0x1f4   :  { %v223_v25 = vadd.f32 %v966_v18, %v222_v22 }
 0x1f6   :  { %v227_v27 = vsel %vm226_vm13, %v966_v18, %v223_v25 }
 0x1f7   :  { %v232_v29 = vsel %vm229_vm14, %v231_v26, %v227_v27 }
 0x1f8   :  { %v235_v30 = vsel %vm1269_vm11, %v968_v28, %v232_v29 }
 0x1f9   :  { %241 = vrot.lane.b32.xlu1 %v235_v30, %s1061_s6 }
 0x201   :  { %236 = vrot.lane.b32.xlu1 %v1230_v63, %s1062_s2 }
 0x209   :  { %140 = vperm.xlu1 %952, %v133_v33  }
 0x26b   :  { %v242_v31 = vpop.permute.xlu1 %241 }
 0x26c   :  { %v244_v32 = vmul.f32 %v242_v31, %v235_v30 }
 0x26e   :  { %246 = vrot.lane.b32.xlu2 %v244_v32, %s1062_s2 }
 0x273   :  { %v237_v34 = vpop.permute.xlu1 %236 }
 0x274   :  { %v239_v35 = vmul.f32 %v237_v34, %v235_v30 }
 0x27b   :  { %v141_v39 = vpop.permute.xlu1 %140 }
 0x27c   :  { %vm143_vm15 = vcmp.eq.s32.totalorder %v135_v8, %v141_v39 }
 0x27d   :  { %v145_v40 = vsel %vm143_vm15, 1.0, %v1060_v10 }
 0x27e   :  { %922 = vmatmul.msk.f32.gmra.mxu1 %vm151_vm6, %v145_v40 }
 0x2c8   :  { %v247_v36 = vpop.permute.xlu2 %246 }
 0x2c9   :  { %v249_v37 = vadd.f32 %v247_v36, %v239_v35 }
 0x2cb   :  { %969 = vtanh.f32 %v249_v37  ;;  %v307_v5 = vrot.slane %v249_v37, 6 }
 0x2d1   :  { %v970_v38 = vpop.eup %969 }
 0x2d2   :  { %252 = vrot.lane.b32.xlu2 %v970_v38, %s1061_s6 }
 0x2fb   :  { %v1289_v44 = vpop.f32.mrf.mxu1 }
 0x32c   :  { %v253_v41 = vpop.permute.xlu2 %252 }
 0x32d   :  { %v1284_v42 = vmul.f32 %v253_v41, %v235_v30 }
 0x32f   :  { %257 = vrot.lane.b32.xlu2 %v1284_v42, %s1062_s2  ;;  %v763_v40 = vrot.slane %v1284_v42, 1 }
 0x389   :  { %v258_v43 = vpop.permute.xlu2 %257 }
 0x38a   :  { %925 = vmatmul.msk.f32.vlgmr.msrb.gmra.mxu1 %vm191_vm5, %v258_v43 }
 0x407   :  { %v278_v45 = vpop.f32.mrf.mxu1 }
 0x408   :  { %v282_v46 = vrot.slane %v278_v45, 6 }
 0x40a   :  { %v284_v47 = vadd.f32 %v282_v46, %v1266_v13 }
 0x40c   :  { %v926_v52 = vmul.f32 -1.442695, %v284_v47 }
 0x40e   :  { %971 = vpow2.f32 %v926_v52 }
 0x414   :  { %v972_v53 = vpop.eup %971 }
 0x415   :  { %v288_v54 = vadd.f32 1.0, %v972_v53 }
 0x417   :  { %973 = vrcp.f32 %v288_v54  ;;  %v300_v58 = vand.u32 2147483648, %v288_v54  ;;  %v298_v60 = vand.u32 2147483647, %v288_v54  ;;  %vm294_vm1 = vweird.f32 %v288_v54 }
 0x418   :  { %975 = vtanh.f32 %v284_v47 }
 0x419   :  { %v301_v62 = vor.u32 1.1754944e-38, %v300_v58  ;;  %vm299_vm3 = vcmp.eq.f32.partialorder %v298_v60, 8.507059e+37 }
 0x41d   :  { %v974_v55 = vpop.eup %973 }
 0x41e   :  { %v290_v56 = vmul.f32 %v974_v55, %v288_v54  ;;  %vm295_vm0 = vweird.f32 %v974_v55  ;;  %v976_v0 = vpop.eup %975 }
 0x41f   :  { %vm296_vm2 = vmor %vm294_vm1, %vm295_vm0  ;;  %vm780_vm1 = vcmask 1042432  }
 0x420   :  { %v291_v57 = vsub.f32 1.0, %v290_v56 }
 0x422   :  { %v292_v59 = vmul.f32 %v974_v55, %v291_v57 }
 0x424   :  { %v293_v61 = vadd.f32 %v974_v55, %v292_v59 }
 0x426   :  { %v297_v63 = vsel %vm296_vm2, %v974_v55, %v293_v61 }
 0x427   :  { %v302_v1 = vsel %vm299_vm3, %v301_v62, %v297_v63 }
 0x428   :  { %v305_v2 = vsel %vm1269_vm11, %v976_v0, %v302_v1 }
 0x429   :  { %311 = vrot.lane.b32.xlu0 %v305_v2, %s1061_s6  ;;  %v309_v6 = vmul.f32 %v307_v5, %v305_v2 }
 0x49b   :  { %v312_v3 = vpop.permute.xlu0 %311 }
 0x49c   :  { %v314_v4 = vmul.f32 %v312_v3, %v305_v2 }
 0x49e   :  { %316 = vrot.lane.b32.xlu1 %v314_v4, %s1062_s2 }
 0x510   :  { %v317_v7 = vpop.permute.xlu1 %316 }
 0x511   :  { %v319_v8 = vadd.f32 %v317_v7, %v309_v6 }
 0x513   :  { %977 = vtanh.f32 %v319_v8  ;;  %v378_v32 = vrot.slane %v319_v8, 6 }
 0x519   :  { %v978_v9 = vpop.eup %977 }
 0x51a   :  { %322 = vrot.lane.b32.xlu2 %v978_v9, %s1061_s6 }
 0x574   :  { %v323_v10 = vpop.permute.xlu2 %322 }
 0x575   :  { %v325_v11 = vmul.f32 %v323_v10, %v305_v2 }
 0x577   :  { %v327_v12 = vrot.slane %v325_v11, 2  ;;  %v748_v37 = vrot.slane %v325_v11, 1 }
 0x579   :  { %328 = vrot.lane.b32.xlu0 %v327_v12, %s1062_s2  ;;  %v777_v46 = vsel %vm776_vm10, %v1284_v42, %v748_v37  ;;  %v790_v47 = vsel %vm776_vm10, %v763_v40, %v327_v12 }
 0x5eb   :  { %v329_v14 = vpop.permute.xlu0 %328 }
 0x5ec   :  { %927 = vmatmul.msk.f32.vlgmr.msrb.gmra.mxu2 %vm191_vm5, %v329_v14 }
 0x5ed   :  { %695 = vmatpush.msrb.mxu2 %v1191_v48 }
 0x5ef   :  { %696 = vmatpush.msrb.mxu2 %v1196_v49 }
 0x5f1   :  { %697 = vmatpush.msrb.mxu2 %v1203_v50 }
 0x5f3   :  { %698 = vmatpush.msrb.mxu2 %v1210_v51 }
 0x66f   :  { %v349_v15 = vpop.f32.mrf.mxu2 }
 0x670   :  { %v353_v16 = vrot.slane %v349_v15, 4 }
 0x672   :  { %v355_v17 = vadd.f32 %v353_v16, %v1266_v13 }
 0x674   :  { %v928_v18 = vmul.f32 -1.442695, %v355_v17 }
 0x676   :  { %979 = vpow2.f32 %v928_v18 }
 0x67c   :  { %v980_v19 = vpop.eup %979 }
 0x67d   :  { %v359_v20 = vadd.f32 1.0, %v980_v19 }
 0x67f   :  { %981 = vrcp.f32 %v359_v20  ;;  %v371_v48 = vand.u32 2147483648, %v359_v20  ;;  %v369_v49 = vand.u32 2147483647, %v359_v20  ;;  %vm365_vm7 = vweird.f32 %v359_v20 }
 0x680   :  { %983 = vtanh.f32 %v355_v17 }
 0x681   :  { %v372_v51 = vor.u32 1.1754944e-38, %v371_v48  ;;  %vm370_vm9 = vcmp.eq.f32.partialorder %v369_v49, 8.507059e+37 }
 0x685   :  { %v982_v21 = vpop.eup %981 }
 0x686   :  { %v361_v22 = vmul.f32 %v982_v21, %v359_v20  ;;  %vm366_vm4 = vweird.f32 %v982_v21  ;;  %v984_v27 = vpop.eup %983 }
 0x687   :  { %vm367_vm8 = vmor %vm365_vm7, %vm366_vm4 }
 0x688   :  { %v362_v23 = vsub.f32 1.0, %v361_v22 }
 0x68a   :  { %v363_v25 = vmul.f32 %v982_v21, %v362_v23 }
 0x68c   :  { %v364_v50 = vadd.f32 %v982_v21, %v363_v25 }
 0x68e   :  { %v368_v26 = vsel %vm367_vm8, %v982_v21, %v364_v50  ;;  %vm782_vm8 = vcmask 1043456  }
 0x68f   :  { %v373_v28 = vsel %vm370_vm9, %v372_v51, %v368_v26 }
 0x690   :  { %v376_v29 = vsel %vm1269_vm11, %v984_v27, %v373_v28 }
 0x691   :  { %382 = vrot.lane.b32.xlu1 %v376_v29, %s1061_s6  ;;  %v380_v33 = vmul.f32 %v378_v32, %v376_v29 }
 0x703   :  { %v383_v30 = vpop.permute.xlu1 %382 }
 0x704   :  { %v385_v31 = vmul.f32 %v383_v30, %v376_v29 }
 0x706   :  { %387 = vrot.lane.b32.xlu2 %v385_v31, %s1062_s2 }
 0x760   :  { %v388_v34 = vpop.permute.xlu2 %387 }
 0x761   :  { %v390_v35 = vadd.f32 %v388_v34, %v380_v33 }
 0x763   :  { %985 = vtanh.f32 %v390_v35  ;;  %v449_v9 = vrot.slane %v390_v35, 6 }
 0x769   :  { %v986_v36 = vpop.eup %985 }
 0x76a   :  { %393 = vrot.lane.b32.xlu0 %v986_v36, %s1061_s6 }
 0x7dc   :  { %v394_v38 = vpop.permute.xlu0 %393 }
 0x7dd   :  { %v396_v39 = vmul.f32 %v394_v38, %v376_v29 }
 0x7df   :  { %v750_v41 = vrot.slane %v396_v39, 2  ;;  %v766_v43 = vrot.slane %v396_v39, 3  ;;  %v398_v45 = vrot.slane %v396_v39, 4 }
 0x7e1   :  { %v779_v52 = vsel %vm778_vm12, %v777_v46, %v750_v41  ;;  %v791_v53 = vsel %vm778_vm12, %v790_v47, %v766_v43  ;;  %399 = vrot.lane.b32.xlu1 %v398_v45, %s1062_s2 }
 0x853   :  { %v400_v54 = vpop.permute.xlu1 %399 }
 0x854   :  { %929 = vmatmul.msk.f32.vlgmr.msra.gmra.mxu3 %vm191_vm5, %v400_v54 }
 0x8d7   :  { %v420_v55 = vpop.f32.mrf.mxu3 }
 0x8d8   :  { %v424_v56 = vrot.slane %v420_v55, 2 }
 0x8da   :  { %v426_v57 = vadd.f32 %v424_v56, %v1266_v13 }
 0x8dc   :  { %v930_v58 = vmul.f32 -1.442695, %v426_v57 }
 0x8de   :  { %987 = vpow2.f32 %v930_v58 }
 0x8e4   :  { %v988_v59 = vpop.eup %987 }
 0x8e5   :  { %v430_v60 = vadd.f32 1.0, %v988_v59 }
 0x8e7   :  { %989 = vrcp.f32 %v430_v60  ;;  %v442_v63 = vand.u32 2147483648, %v430_v60  ;;  %v440_v1 = vand.u32 2147483647, %v430_v60  ;;  %vm436_vm14 = vweird.f32 %v430_v60 }
 0x8e8   :  { %991 = vtanh.f32 %v426_v57 }
 0x8e9   :  { %v443_v3 = vor.u32 1.1754944e-38, %v442_v63  ;;  %vm441_vm0 = vcmp.eq.f32.partialorder %v440_v1, 8.507059e+37 }
 0x8ed   :  { %v990_v61 = vpop.eup %989 }
 0x8ee   :  { %v432_v62 = vmul.f32 %v990_v61, %v430_v60  ;;  %vm437_vm13 = vweird.f32 %v990_v61  ;;  %v992_v13 = vpop.eup %991 }
 0x8ef   :  { %vm438_vm15 = vmor %vm436_vm14, %vm437_vm13  ;;  %vm784_vm14 = vcmask 1044480  }
 0x8f0   :  { %v433_v42 = vsub.f32 1.0, %v432_v62 }
 0x8f2   :  { %v434_v0 = vmul.f32 %v990_v61, %v433_v42 }
 0x8f4   :  { %v435_v2 = vadd.f32 %v990_v61, %v434_v0 }
 0x8f6   :  { %v439_v4 = vsel %vm438_vm15, %v990_v61, %v435_v2 }
 0x8f7   :  { %v444_v5 = vsel %vm441_vm0, %v443_v3, %v439_v4 }
 0x8f8   :  { %v447_v6 = vsel %vm1269_vm11, %v992_v13, %v444_v5 }
 0x8f9   :  { %453 = vrot.lane.b32.xlu2 %v447_v6, %s1061_s6  ;;  %v451_v10 = vmul.f32 %v449_v9, %v447_v6 }
 0x953   :  { %v454_v7 = vpop.permute.xlu2 %453 }
 0x954   :  { %v456_v8 = vmul.f32 %v454_v7, %v447_v6 }
 0x956   :  { %458 = vrot.lane.b32.xlu0 %v456_v8, %s1062_s2 }
 0x9c8   :  { %v459_v11 = vpop.permute.xlu0 %458 }
 0x9c9   :  { %v461_v12 = vadd.f32 %v459_v11, %v451_v10 }
 0x9cb   :  { %993 = vtanh.f32 %v461_v12  ;;  %v517_v39 = vrot.slane %v461_v12, 6 }
 0x9d1   :  { %v994_v14 = vpop.eup %993 }
 0x9d2   :  { %464 = vrot.lane.b32.xlu1 %v994_v14, %s1061_s6 }
 0xa44   :  { %v465_v15 = vpop.permute.xlu1 %464 }
 0xa45   :  { %v467_v16 = vmul.f32 %v465_v15, %v447_v6 }
 0xa47   :  { %v752_v17 = vrot.slane %v467_v16, 3  ;;  %v768_v18 = vrot.slane %v467_v16, 4  ;;  %v469_v19 = vrot.slane %v467_v16, 6 }
 0xa49   :  { %v781_v20 = vsel %vm780_vm1, %v779_v52, %v752_v17  ;;  %v792_v21 = vsel %vm780_vm1, %v791_v53, %v768_v18  ;;  %470 = vrot.lane.b32.xlu2 %v469_v19, %s1062_s2 }
 0xaa3   :  { %v471_v22 = vpop.permute.xlu2 %470 }
 0xaa4   :  { %931 = vmatmul.msk.f32.vlgmr.msra.gmra.mxu2 %vm191_vm5, %v471_v22 }
 0xb27   :  { %v491_v23 = vpop.f32.mrf.mxu2 }
 0xb28   :  { %v494_v48 = vadd.f32 %v491_v23, %v1289_v44 }
 0xb2a   :  { %v932_v25 = vmul.f32 -1.442695, %v494_v48 }
 0xb2c   :  { %995 = vpow2.f32 %v932_v25 }
 0xb32   :  { %v996_v49 = vpop.eup %995 }
 0xb33   :  { %v498_v50 = vadd.f32 1.0, %v996_v49 }
 0xb35   :  { %997 = vrcp.f32 %v498_v50  ;;  %v510_v28 = vand.u32 2147483648, %v498_v50  ;;  %v508_v30 = vand.u32 2147483647, %v498_v50  ;;  %vm504_vm3 = vweird.f32 %v498_v50 }
 0xb36   :  { %999 = vtanh.f32 %v494_v48 }
 0xb37   :  { %v511_v32 = vor.u32 1.1754944e-38, %v510_v28  ;;  %vm509_vm7 = vcmp.eq.f32.partialorder %v508_v30, 8.507059e+37 }
 0xb3b   :  { %v998_v51 = vpop.eup %997 }
 0xb3c   :  { %v500_v26 = vmul.f32 %v998_v51, %v498_v50  ;;  %vm505_vm2 = vweird.f32 %v998_v51  ;;  %v1000_v34 = vpop.eup %999 }
 0xb3d   :  { %vm506_vm4 = vmor %vm504_vm3, %vm505_vm2  ;;  %vm786_vm3 = vcmask 1045504  }
 0xb3e   :  { %v501_v27 = vsub.f32 1.0, %v500_v26 }
 0xb40   :  { %v502_v29 = vmul.f32 %v998_v51, %v501_v27 }
 0xb42   :  { %v503_v31 = vadd.f32 %v998_v51, %v502_v29 }
 0xb44   :  { %v507_v33 = vsel %vm506_vm4, %v998_v51, %v503_v31 }
 0xb45   :  { %v512_v35 = vsel %vm509_vm7, %v511_v32, %v507_v33 }
 0xb46   :  { %v515_v36 = vsel %vm1269_vm11, %v1000_v34, %v512_v35 }
 0xb47   :  { %521 = vrot.lane.b32.xlu0 %v515_v36, %s1061_s6  ;;  %v519_v40 = vmul.f32 %v517_v39, %v515_v36 }
 0xbb9   :  { %v522_v37 = vpop.permute.xlu0 %521 }
 0xbba   :  { %v524_v38 = vmul.f32 %v522_v37, %v515_v36 }
 0xbbc   :  { %526 = vrot.lane.b32.xlu1 %v524_v38, %s1062_s2 }
 0xc2e   :  { %v527_v41 = vpop.permute.xlu1 %526 }
 0xc2f   :  { %v529_v43 = vadd.f32 %v527_v41, %v519_v40 }
 0xc31   :  { %1001 = vtanh.f32 %v529_v43  ;;  %v587_v11 = vrot.slane %v529_v43, 6 }
 0xc37   :  { %v1002_v45 = vpop.eup %1001 }
 0xc38   :  { %532 = vrot.lane.b32.xlu2 %v1002_v45, %s1061_s6 }
 0xc92   :  { %v533_v46 = vpop.permute.xlu2 %532 }
 0xc93   :  { %v535_v47 = vmul.f32 %v533_v46, %v515_v36 }
 0xc95   :  { %v754_v52 = vrot.slane %v535_v47, 4  ;;  %v770_v53 = vrot.slane %v535_v47, 5  ;;  %537 = vrot.lane.b32.xlu0 %v535_v47, %s1062_s2 }
 0xc97   :  { %v783_v54 = vsel %vm782_vm8, %v781_v20, %v754_v52  ;;  %v793_v55 = vsel %vm782_vm8, %v792_v21, %v770_v53 }
 0xd07   :  { %v538_v56 = vpop.permute.xlu0 %537 }
 0xd08   :  { %933 = vmatmul.msk.f32.vlgmr.msrb.gmra.mxu3 %vm191_vm5, %v538_v56 }
 0xd8b   :  { %v558_v57 = vpop.f32.mrf.mxu3 }
 0xd8c   :  { %v562_v58 = vrot.slane %v558_v57, 6 }
 0xd8e   :  { %v564_v59 = vadd.f32 %v562_v58, %v1289_v44 }
 0xd90   :  { %v934_v60 = vmul.f32 -1.442695, %v564_v59 }
 0xd92   :  { %1003 = vpow2.f32 %v934_v60 }
 0xd98   :  { %v1004_v61 = vpop.eup %1003 }
 0xd99   :  { %v568_v62 = vadd.f32 1.0, %v1004_v61 }
 0xd9b   :  { %1005 = vrcp.f32 %v568_v62  ;;  %v580_v1 = vand.u32 2147483648, %v568_v62  ;;  %v578_v3 = vand.u32 2147483647, %v568_v62  ;;  %vm574_vm10 = vweird.f32 %v568_v62 }
 0xd9c   :  { %1007 = vtanh.f32 %v564_v59 }
 0xd9d   :  { %v581_v13 = vor.u32 1.1754944e-38, %v580_v1  ;;  %vm579_vm13 = vcmp.eq.f32.partialorder %v578_v3, 8.507059e+37 }
 0xda1   :  { %v1006_v42 = vpop.eup %1005 }
 0xda2   :  { %v570_v63 = vmul.f32 %v1006_v42, %v568_v62  ;;  %vm575_vm9 = vweird.f32 %v1006_v42  ;;  %v1008_v6 = vpop.eup %1007 }
 0xda3   :  { %vm576_vm12 = vmor %vm574_vm10, %vm575_vm9  ;;  %vm797_vm10 = vcmask 1048320  }
 0xda4   :  { %v571_v0 = vsub.f32 1.0, %v570_v63 }
 0xda6   :  { %v572_v2 = vmul.f32 %v1006_v42, %v571_v0 }
 0xda8   :  { %v573_v4 = vadd.f32 %v1006_v42, %v572_v2 }
 0xdaa   :  { %v577_v5 = vsel %vm576_vm12, %v1006_v42, %v573_v4 }
 0xdab   :  { %v582_v7 = vsel %vm579_vm13, %v581_v13, %v577_v5 }
 0xdac   :  { %v585_v8 = vsel %vm1269_vm11, %v1008_v6, %v582_v7 }
 0xdad   :  { %591 = vrot.lane.b32.xlu1 %v585_v8, %s1061_s6  ;;  %v589_v12 = vmul.f32 %v587_v11, %v585_v8 }
 0xe1f   :  { %v592_v9 = vpop.permute.xlu1 %591 }
 0xe20   :  { %v594_v10 = vmul.f32 %v592_v9, %v585_v8 }
 0xe22   :  { %596 = vrot.lane.b32.xlu2 %v594_v10, %s1062_s2 }
 0xe7c   :  { %v597_v14 = vpop.permute.xlu2 %596 }
 0xe7d   :  { %v599_v15 = vadd.f32 %v597_v14, %v589_v12 }
 0xe7f   :  { %1009 = vtanh.f32 %v599_v15  ;;  %v658_v43 = vrot.slane %v599_v15, 6  ;;  %v956_v15 = vld [vmem:[%s1395_s8] ss:$0 sm:$0xff] }
 0xe85   :  { %v1010_v16 = vpop.eup %1009 }
 0xe86   :  { %602 = vrot.lane.b32.xlu0 %v1010_v16, %s1061_s6  ;;  %v957_v16 = vld [vmem:[%s1396_s9] ss:$0 sm:$0xff] }
 0xef8   :  { %v603_v17 = vpop.permute.xlu0 %602 }
 0xef9   :  { %v605_v18 = vmul.f32 %v603_v17, %v585_v8 }
 0xefb   :  { %v756_v19 = vrot.slane %v605_v18, 5  ;;  %v772_v20 = vrot.slane %v605_v18, 6  ;;  %v607_v21 = vrot.slane %v605_v18, 2 }
 0xefd   :  { %v785_v22 = vsel %vm784_vm14, %v783_v54, %v756_v19  ;;  %608 = vrot.lane.b32.xlu1 %v607_v21, %s1062_s2  ;;  %v794_v23 = vsel %vm784_vm14, %v793_v55, %v772_v20  ;;  %v1063_v21 = vmov 16.0  }
 0xf6f   :  { %v609_v48 = vpop.permute.xlu1 %608 }
 0xf70   :  { %935 = vmatmul.msk.f32.vlgmr.msra.gmra.mxu1 %vm191_vm5, %v609_v48 }
 0xfed   :  { %v629_v25 = vpop.f32.mrf.mxu1 }
 0xfee   :  { %v633_v49 = vrot.slane %v629_v25, 4 }
 0xff0   :  { %v635_v50 = vadd.f32 %v633_v49, %v1289_v44 }
 0xff2   :  { %v936_v51 = vmul.f32 -1.442695, %v635_v50 }
 0xff4   :  { %1011 = vpow2.f32 %v936_v51 }
 0xffa   :  { %v1012_v26 = vpop.eup %1011 }
 0xffb   :  { %v639_v27 = vadd.f32 1.0, %v1012_v26 }
 0xffd   :  { %1013 = vrcp.f32 %v639_v27  ;;  %v651_v31 = vand.u32 2147483648, %v639_v27  ;;  %v649_v33 = vand.u32 2147483647, %v639_v27  ;;  %vm645_vm0 = vweird.f32 %v639_v27 }
 0xffe   :  { %1015 = vtanh.f32 %v635_v50 }
 0xfff   :  { %v652_v35 = vor.u32 1.1754944e-38, %v651_v31  ;;  %vm650_vm2 = vcmp.eq.f32.partialorder %v649_v33, 8.507059e+37 }
0x1003   :  { %v1014_v28 = vpop.eup %1013 }
0x1004   :  { %v641_v29 = vmul.f32 %v1014_v28, %v639_v27  ;;  %vm646_vm15 = vweird.f32 %v1014_v28  ;;  %v1016_v37 = vpop.eup %1015 }
0x1005   :  { %vm647_vm1 = vmor %vm645_vm0, %vm646_vm15 }
0x1006   :  { %v642_v30 = vsub.f32 1.0, %v641_v29 }
0x1008   :  { %v643_v32 = vmul.f32 %v1014_v28, %v642_v30 }
0x100a   :  { %v644_v34 = vadd.f32 %v1014_v28, %v643_v32 }
0x100c   :  { %v648_v36 = vsel %vm647_vm1, %v1014_v28, %v644_v34 }
0x100d   :  { %v653_v38 = vsel %vm650_vm2, %v652_v35, %v648_v36 }
0x100e   :  { %v656_v39 = vsel %vm1269_vm11, %v1016_v37, %v653_v38 }
0x100f   :  { %662 = vrot.lane.b32.xlu2 %v656_v39, %s1061_s6  ;;  %v660_v45 = vmul.f32 %v658_v43, %v656_v39 }
0x1069   :  { %v663_v40 = vpop.permute.xlu2 %662 }
0x106a   :  { %v665_v41 = vmul.f32 %v663_v40, %v656_v39 }
0x106c   :  { %667 = vrot.lane.b32.xlu0 %v665_v41, %s1062_s2 }
0x10de   :  { %v668_v46 = vpop.permute.xlu0 %667 }
0x10df   :  { %v670_v47 = vadd.f32 %v668_v46, %v660_v45 }
0x10e1   :  { %1017 = vtanh.f32 %v670_v47  ;;  %v729_v24 = vrot.slane %v670_v47, 6 }
0x10e7   :  { %v1018_v52 = vpop.eup %1017 }
0x10e8   :  { %673 = vrot.lane.b32.xlu1 %v1018_v52, %s1061_s6 }
0x115a   :  { %v674_v53 = vpop.permute.xlu1 %673 }
0x115b   :  { %v676_v54 = vmul.f32 %v674_v53, %v656_v39 }
0x115d   :  { %v758_v55 = vrot.slane %v676_v54, 6  ;;  %v774_v56 = vrot.slane %v676_v54, 7  ;;  %v678_v57 = vrot.slane %v676_v54, 4 }
0x115f   :  { %679 = vrot.lane.b32.xlu2 %v678_v57, %s1062_s2  ;;  %v795_v58 = vsel %vm786_vm3, %v794_v23, %v774_v56  ;;  %v787_v59 = vsel %vm786_vm3, %v785_v22, %v758_v55 }
0x11b9   :  { %v680_v60 = vpop.permute.xlu2 %679 }
0x11ba   :  { %937 = vmatmul.msk.f32.vlgmr.msrb.gmra.mxu2 %vm191_vm5, %v680_v60 }
0x123d   :  { %v700_v61 = vpop.f32.mrf.mxu2 }
0x123e   :  { %v704_v62 = vrot.slane %v700_v61, 2  ;;  %v859_v61 = vld [vmem:[%s1397_s10 + $0x8] sm:$0xff] }
0x1240   :  { %v706_v42 = vadd.f32 %v704_v62, %v1289_v44 }
0x1242   :  { %v938_v63 = vmul.f32 -1.442695, %v706_v42 }
0x1244   :  { %1019 = vpow2.f32 %v938_v63 }
0x124a   :  { %v1020_v0 = vpop.eup %1019 }
0x124b   :  { %v710_v1 = vadd.f32 1.0, %v1020_v0 }
0x124d   :  { %1021 = vrcp.f32 %v710_v1  ;;  %v722_v13 = vand.u32 2147483648, %v710_v1  ;;  %v720_v6 = vand.u32 2147483647, %v710_v1  ;;  %vm716_vm7 = vweird.f32 %v710_v1 }
0x124e   :  { %1023 = vtanh.f32 %v706_v42  ;;  %v858_v42 = vld [vmem:[%s1397_s10] sm:$0xff] }
0x124f   :  { %v723_v8 = vor.u32 1.1754944e-38, %v722_v13  ;;  %vm721_vm9 = vcmp.eq.f32.partialorder %v720_v6, 8.507059e+37 }
0x1253   :  { %v1022_v2 = vpop.eup %1021 }
0x1254   :  { %v712_v3 = vmul.f32 %v1022_v2, %v710_v1  ;;  %vm717_vm4 = vweird.f32 %v1022_v2  ;;  %v1024_v44 = vpop.eup %1023 }
0x1255   :  { %vm718_vm8 = vmor %vm716_vm7, %vm717_vm4 }
0x1256   :  { %v713_v4 = vsub.f32 1.0, %v712_v3 }
0x1258   :  { %v714_v5 = vmul.f32 %v1022_v2, %v713_v4 }
0x125a   :  { %v715_v7 = vadd.f32 %v1022_v2, %v714_v5 }
0x125c   :  { %v719_v9 = vsel %vm718_vm8, %v1022_v2, %v715_v7 }
0x125d   :  { %v724_v10 = vsel %vm721_vm9, %v723_v8, %v719_v9 }
0x125e   :  { %v727_v11 = vsel %vm1269_vm11, %v1024_v44, %v724_v10  ;;  %vm788_vm11 = vcmask 1046528  }
0x125f   :  { %733 = vrot.lane.b32.xlu0 %v727_v11, %s1061_s6  ;;  %v731_v17 = vmul.f32 %v729_v24, %v727_v11 }
0x1267   :  { %845 = vrot.lane.b32.xlu0 %v956_v15, %s1059_s29 }
0x12d1   :  { %v734_v12 = vpop.permute.xlu0 %733 }
0x12d2   :  { %v736_v14 = vmul.f32 %v734_v12, %v727_v11 }
0x12d4   :  { %738 = vrot.lane.b32.xlu1 %v736_v14, %s1062_s2 }
0x12d9   :  { %v846_v5 = vpop.permute.xlu0 %845 }
0x12dc   :  { %853 = vrot.lane.b32.xlu1 %v957_v16, %s1059_s29  ;;  %v958_v16 = vld [vmem:[%s1398_s11] ss:$0 sm:$0xff]  ;;  %s1066_s11 = smov 8  }
0x1346   :  { %v739_v18 = vpop.permute.xlu1 %738 }
0x1347   :  { %v741_v19 = vadd.f32 %v739_v18, %v731_v17 }
0x1349   :  { %1025 = vtanh.f32 %v741_v19 }
0x134a   :  { %1027 = vrcp.f32 %v1063_v21 }
0x134e   :  { %v854_v9 = vpop.permute.xlu1 %853 }
0x134f   :  { %v1026_v20 = vpop.eup %1025 }
0x1350   :  { %744 = vrot.lane.b32.xlu2 %v1026_v20, %s1061_s6  ;;  %v1028_v22 = vpop.eup %1027 }
0x1351   :  { %v808_v25 = vmul.f32 16.0, %v1028_v22  ;;  %vm812_vm12 = vweird.f32 %v1028_v22 }
0x1353   :  { %v809_v27 = vsub.f32 1.0, %v808_v25 }
0x1355   :  { %v810_v31 = vmul.f32 %v1028_v22, %v809_v27 }
0x1357   :  { %v811_v34 = vadd.f32 %v1028_v22, %v810_v31 }
0x1359   :  { %v813_v37 = vsel %vm812_vm12, %v1028_v22, %v811_v34 }
0x13aa   :  { %v745_v23 = vpop.permute.xlu2 %744 }
0x13ab   :  { %v747_v48 = vmul.f32 %v745_v23, %v727_v11 }
0x13ad   :  { %v761_v49 = vrot.slane %v747_v48, 7  ;;  %v796_v50 = vsel %vm788_vm11, %v795_v58, %v747_v48  ;;  %v861_v58 = vld [vmem:[%s1397_s10 + $0x18] sm:$0xff] }
0x13ae   :  { %v799_v26 = vsel %vm797_vm10, %v796_v50, 0.0  ;;  %888 = vmatpush.msra.mxu3 %v861_v58 }
0x13af   :  { %v789_v51 = vsel %vm788_vm11, %v787_v59, %v761_v49  ;;  %v860_v59 = vld [vmem:[%s1397_s10 + $0x10] sm:$0xff] }
0x13b0   :  { %v798_v28 = vsel %vm797_vm10, %v789_v51, 0.0  ;;  %889 = vmatpush.msra.mxu3 %v860_v59 }
0x13b1   :  { %v800_v29 = vadd.f32 %v799_v26, %v798_v28 }
0x13b2   :  { %890 = vmatpush.msra.mxu3 %v859_v61 }
0x13b3   :  { %v801_v30 = vrot.slane %v800_v29, 4 }
0x13b4   :  { %891 = vmatpush.msra.mxu3 %v858_v42 }
0x13b5   :  { %v802_v32 = vadd.f32 %v801_v30, %v800_v29 }
0x13b7   :  { %v803_v33 = vrot.slane %v802_v32, 2 }
0x13b9   :  { %v804_v35 = vadd.f32 %v803_v33, %v802_v32 }
0x13bb   :  { %v805_v36 = vrot.slane %v804_v35, 1 }
0x13bd   :  { %v806_v38 = vadd.f32 %v805_v36, %v804_v35 }
0x13bf   :  { %v814_v39 = vmul.f32 %v813_v37, %v806_v38 }
0x13c1   :  { %v815_v40 = vsub.f32 %v789_v51, %v814_v39  ;;  %v816_v41 = vsub.f32 %v796_v50, %v814_v39 }
0x13c3   :  { %v817_v43 = vmul.f32 %v815_v40, %v815_v40  ;;  %v818_v45 = vmul.f32 %v816_v41, %v816_v41 }
0x13c5   :  { %v819_v46 = vsel %vm797_vm10, %v817_v43, 0.0  ;;  %v820_v47 = vsel %vm797_vm10, %v818_v45, 0.0 }
0x13c6   :  { %v821_v52 = vadd.f32 %v820_v47, %v819_v46 }
0x13c8   :  { %v822_v53 = vrot.slane %v821_v52, 4 }
0x13ca   :  { %v823_v54 = vadd.f32 %v822_v53, %v821_v52 }
0x13cc   :  { %v824_v55 = vrot.slane %v823_v54, 2 }
0x13ce   :  { %v825_v56 = vadd.f32 %v824_v55, %v823_v54 }
0x13d0   :  { %v826_v57 = vrot.slane %v825_v56, 1 }
0x13d2   :  { %v827_v60 = vadd.f32 %v826_v57, %v825_v56 }
0x13d4   :  { %v828_v62 = vmul.f32 %v827_v60, %v813_v37 }
0x13d6   :  { %v829_v63 = vadd.f32 1e-05, %v828_v62 }
0x13d8   :  { %1029 = vrsqrt.f32 %v829_v63  ;;  %vm836_vm14 = vweird.f32 %v829_v63 }
0x13de   :  { %v1030_v0 = vpop.eup %1029 }
0x13df   :  { %v831_v1 = vmul.f32 %v1030_v0, %v829_v63  ;;  %vm837_vm13 = vweird.f32 %v1030_v0 }
0x13e0   :  { %vm838_vm15 = vmor %vm836_vm14, %vm837_vm13 }
0x13e1   :  { %v832_v2 = vmul.f32 %v1030_v0, %v831_v1 }
0x13e3   :  { %v833_v3 = vmul.f32 0.5, %v832_v2 }
0x13e5   :  { %v834_v4 = vsub.f32 1.5, %v833_v3 }
0x13e7   :  { %v835_v13 = vmul.f32 %v1030_v0, %v834_v4 }
0x13e9   :  { %v839_v6 = vsel %vm838_vm15, %v1030_v0, %v835_v13 }
0x13ea   :  { %v840_v7 = vmul.f32 %v839_v6, %v815_v40  ;;  %v841_v8 = vmul.f32 %v839_v6, %v816_v41 }
0x13ec   :  { %v848_v44 = vmul.f32 %v846_v5, %v840_v7  ;;  %v849_v10 = vmul.f32 %v846_v5, %v841_v8 }
0x13ee   :  { %v856_v11 = vadd.f32 %v854_v9, %v848_v44  ;;  %v857_v12 = vadd.f32 %v854_v9, %v849_v10 }
0x13f0   :  { %870 = vrot.lane.b32.xlu0 %v857_v12, %s1062_s2  ;;  %868 = vrot.lane.b32.xlu2 %v856_v11, %s1062_s2 }
0x144a   :  { %v869_v14 = vpop.permute.xlu2 %868 }
0x144b   :  { %939 = vmatmul.msk.f32.vlgmr.msra.gmra.mxu3 %vm191_vm5, %v869_v14 }
0x1462   :  { %v871_v15 = vpop.permute.xlu0 %870 }
0x1463   :  { %940 = vmatmul.msk.f32.gmra.mxu3 %vm191_vm5, %v871_v15 }
0x14ce   :  { %v893_v24 = vpop.f32.mrf.mxu3 }
0x14cf   :  { %v894_v17 = vadd.f32 %v958_v16, %v893_v24 }
0x14d1   :  { %v899_v18 = vmax.f32 %v894_v17, 0.0 }
0x14d3   :  { %901 = vst.msk [vmem:[#allocation2] sm:$0xff] %vm151_vm6, %v899_v18 }
0x14e6   :  { %v896_v19 = vpop.f32.mrf.mxu3 }
0x14e7   :  { %v897_v20 = vadd.f32 %v958_v16, %v896_v19 }
0x14e9   :  { %v900_v21 = vmax.f32 %v897_v20, 0.0 }
0x14eb   :  { %902 = vst.msk [vmem:[#allocation2 + $0x8] sm:$0xff] %vm151_vm6, %v900_v21 }
0x14ec   :  { %915 = dma.vmem_to_hbm [thread:$0]  %s908_s14, 256, %s910_s16, [#allocation3], %s1065_s5, %s1065_s5, %s1066_s11  }
0x14ed   :  { %1055 = dma.done.wait [#allocation3], 256  }
0x14ee   :  { %1056 = vsyncadd [#allocation3], 4294967040 }
0x14ef   :  { %920 = vsyncpa [#allocation3], 1 }

</bundles_post_ra>
